<compile_context>
chip_gen: v7x
topology: tpu7x:2x2x1
jax: 0.10.0
libtpu: 0.0.40
codegen_flags: <defaults>
</compile_context>

<pallas_src>
import jax
import jax.numpy as jnp
from jax import lax
from jax.experimental import pallas as pl
from jax.experimental.pallas import tpu as pltpu


def _mlp_kernel(x_ref, w1_ref, b1_ref, w2_ref, b2_ref, w3_ref, b3_ref, o_ref):
    # x arrives in native [Bt, F] layout (f32); cast to compute dtype on the VPU.
    x = x_ref[...].astype(w1_ref.dtype)                                   # [Bt, F] bf16
    # Layer 1: contract on F straight from the native layout:
    #   [H1, F] . [Bt, F]^T -> [H1, Bt]   (batch on lanes from here on)
    h1 = lax.dot_general(w1_ref[...], x, (((1,), (1,)), ((), ())),
                         preferred_element_type=jnp.float32)              # [50, Bt]
    h1 = jnp.maximum(h1 + b1_ref[...], 0.0)
    # Layer 2: [H2, H1] @ [H1, Bt]
    h2 = jnp.dot(w2_ref[...], h1.astype(w2_ref.dtype),
                 preferred_element_type=jnp.float32)                      # [25, Bt]
    h2 = jnp.maximum(h2 + b2_ref[...], 0.0)
    # Layer 3: [1, H2] @ [H2, Bt] -> lane-dense [1, Bt] store
    out = jnp.dot(w3_ref[...], h2.astype(w3_ref.dtype),
                  preferred_element_type=jnp.float32) + b3_ref[...]       # [1, Bt]
    o_ref[...] = out.astype(o_ref.dtype)


def _cdiv(a, b):
    return (a + b - 1) // b


def _round_up(x, m):
    return _cdiv(x, m) * m


def _choose_batch_tile(B, F, itemsize, *, target_bytes, lane=128):
    """Batch rows per tile from a per-buffer VMEM byte budget; balanced & 128-aligned."""
    rows_per_budget = max(lane, (target_bytes // max(1, itemsize * F)) // lane * lane)
    n_tiles = max(1, _cdiv(B, rows_per_budget))
    # Keep >= 2 tiles when there is enough batch so both v7x TensorCores get work
    # (and DMA/compute overlap has at least one step of slack).
    if n_tiles == 1 and B >= 2 * lane:
        n_tiles = 2
    # Balanced tiles: avoids a mostly-padded final tile for awkward B.
    return _round_up(_cdiv(B, n_tiles), lane)


def price_predictor_forward(x, params, *, compute_dtype=jnp.bfloat16,
                            vmem_bytes_per_x_buffer=4 << 20):
    """x: [B, input_size] float32 (native layout, streamed as-is).
    params use the PyTorch nn.Linear convention: w*: [out_features, in_features], b*: [out]."""
    B, F = x.shape
    H1 = params["w1"].shape[0]
    H2 = params["w2"].shape[0]

    b_tile = _choose_batch_tile(B, F, jnp.dtype(x.dtype).itemsize,
                                target_bytes=vmem_bytes_per_x_buffer)
    grid = (_cdiv(B, b_tile),)

    # Weights in compute dtype for the MXU; biases stay f32 for the epilogue, shaped [out, 1].
    w1 = params["w1"].astype(compute_dtype)                 # [50, F]
    w2 = params["w2"].astype(compute_dtype)                 # [25, 50]
    w3 = params["w3"].astype(compute_dtype)                 # [1, 25]
    b1 = params["b1"].astype(jnp.float32).reshape(H1, 1)
    b2 = params["b2"].astype(jnp.float32).reshape(H2, 1)
    b3 = params["b3"].astype(jnp.float32).reshape(1, 1)

    def resident(a):
        # Full-array block, constant index map -> loaded once, stays VMEM-resident across steps.
        return pl.BlockSpec(a.shape, lambda i: (0, 0))

    outT = pl.pallas_call(
        _mlp_kernel,
        out_shape=jax.ShapeDtypeStruct((1, B), jnp.float32),
        grid=grid,
        in_specs=[
            # Native-layout x tiles: contiguous HBM ranges, double-buffered DMA stream.
            pl.BlockSpec((b_tile, F), lambda i: (i, 0)),
            resident(w1), resident(b1),
            resident(w2), resident(b2),
            resident(w3), resident(b3),
        ],
        out_specs=pl.BlockSpec((1, b_tile), lambda i: (0, i)),
        compiler_params=pltpu.CompilerParams(
            dimension_semantics=("parallel",)),
    )(x, w1, b1, w2, b2, w3, b3)

    # Back to the PyTorch output layout [B, 1] (tiny: only B elements).
    return jnp.transpose(outT)


def init_params(key, input_size):
    """Deterministic init mirroring nn.Linear (weights [out, in], biases [out])."""
    keys = jax.random.split(key, 6)

    def uniform(k, shape, fan_in):
        bound = 1.0 / jnp.sqrt(jnp.float32(fan_in))
        return jax.random.uniform(k, shape, jnp.float32, -bound, bound)

    return {
        "w1": uniform(keys[0], (50, input_size), input_size),
        "b1": uniform(keys[1], (50,), input_size),
        "w2": uniform(keys[2], (25, 50), 50),
        "b2": uniform(keys[3], (25,), 50),
        "w3": uniform(keys[4], (1, 25), 25),
        "b3": uniform(keys[5], (1,), 25),
    }


def reference_forward(x, params, compute_dtype=jnp.bfloat16):
    """Pure-JAX reference using the same bf16-input / f32-accumulate numerics as the kernel."""
    cd = compute_dtype
    h1 = jnp.dot(x.astype(cd), params["w1"].astype(cd).T,
                 preferred_element_type=jnp.float32) + params["b1"]
    h1 = jnp.maximum(h1, 0.0)
    h2 = jnp.dot(h1.astype(cd), params["w2"].astype(cd).T,
                 preferred_element_type=jnp.float32) + params["b2"]
    h2 = jnp.maximum(h2, 0.0)
    out = jnp.dot(h2.astype(cd), params["w3"].astype(cd).T,
                  preferred_element_type=jnp.float32) + params["b3"]
    return out


if __name__ == "__main__":
    key = jax.random.PRNGKey(0)
    k_x, k_p = jax.random.split(key)

    batch, input_size = 8, 32
    x = jax.random.normal(k_x, (batch, input_size), jnp.float32)
    params = init_params(k_p, input_size)

    out = price_predictor_forward(x, params)
    out = jax.block_until_ready(out)

    ref = reference_forward(x, params)
    assert out.shape == (batch, 1), out.shape
    assert jnp.allclose(out, ref, atol=5e-3, rtol=5e-3), "mismatch vs reference"

    print("KERNEL_OK")
</pallas_src>

<mosaic_0001>
module attributes {stable_mosaic.version = 11 : i64} {
  func.func @_mlp_kernel(%arg0: i32, %arg1: memref<128x32xf32, #tpu.memory_space<vmem>>, %arg2: memref<50x32xbf16, #tpu.memory_space<vmem>>, %arg3: memref<50x1xf32, #tpu.memory_space<vmem>>, %arg4: memref<25x50xbf16, #tpu.memory_space<vmem>>, %arg5: memref<25x1xf32, #tpu.memory_space<vmem>>, %arg6: memref<1x25xbf16, #tpu.memory_space<vmem>>, %arg7: memref<1x1xf32, #tpu.memory_space<vmem>>, %arg8: memref<1x128xf32, #tpu.memory_space<vmem>>) attributes {dimension_semantics = [#tpu.dimension_semantics<parallel>], iteration_bounds = array<i64: 1>, scalar_prefetch = 0 : i64, scratch_operands = 0 : i64, tpu.core_type = #tpu.core_type<tc>, window_params = [{transform_indices = @transform_0, window_bounds = array<i64: 128, 32>}, {pipeline_mode = #tpu.pipeline_mode<synchronous>, transform_indices = @transform_1, window_bounds = array<i64: 50, 32>}, {pipeline_mode = #tpu.pipeline_mode<synchronous>, transform_indices = @transform_2, window_bounds = array<i64: 50, 1>}, {pipeline_mode = #tpu.pipeline_mode<synchronous>, transform_indices = @transform_3, window_bounds = array<i64: 25, 50>}, {pipeline_mode = #tpu.pipeline_mode<synchronous>, transform_indices = @transform_4, window_bounds = array<i64: 25, 1>}, {pipeline_mode = #tpu.pipeline_mode<synchronous>, transform_indices = @transform_5, window_bounds = array<i64: 1, 25>}, {pipeline_mode = #tpu.pipeline_mode<synchronous>, transform_indices = @transform_6, window_bounds = array<i64: 1, 1>}, {transform_indices = @transform_7, window_bounds = array<i64: 1, 128>}]} {
    %c0 = arith.constant 0 : index
    %c0_0 = arith.constant 0 : index
    %0 = vector.load %arg1[%c0, %c0_0] : memref<128x32xf32, #tpu.memory_space<vmem>>, vector<128x32xf32>
    %1 = arith.truncf %0 : vector<128x32xf32> to vector<128x32xbf16>
    %c0_1 = arith.constant 0 : index
    %c0_2 = arith.constant 0 : index
    %2 = vector.load %arg2[%c0_1, %c0_2] : memref<50x32xbf16, #tpu.memory_space<vmem>>, vector<50x32xbf16>
    %cst = arith.constant dense<0.000000e+00> : vector<50x128xf32>
    %3 = tpu.matmul %2, %1, %cst {dimension_numbers = #tpu.dot_dimension_numbers<[1], [1], [0], [0], [0, 0, 1, 0], [], []>} : vector<50x32xbf16>, vector<128x32xbf16>, vector<50x128xf32> -> vector<50x128xf32>
    %c0_3 = arith.constant 0 : index
    %c0_4 = arith.constant 0 : index
    %4 = vector.load %arg3[%c0_3, %c0_4] : memref<50x1xf32, #tpu.memory_space<vmem>>, vector<50x1xf32>
    %5 = vector.broadcast %4 : vector<50x1xf32> to vector<50x128xf32>
    %6 = arith.addf %3, %5 : vector<50x128xf32>
    %cst_5 = arith.constant 0.000000e+00 : f32
    %7 = vector.broadcast %cst_5 : f32 to vector<50x128xf32>
    %8 = arith.maximumf %6, %7 : vector<50x128xf32>
    %c0_6 = arith.constant 0 : index
    %c0_7 = arith.constant 0 : index
    %9 = vector.load %arg4[%c0_6, %c0_7] : memref<25x50xbf16, #tpu.memory_space<vmem>>, vector<25x50xbf16>
    %10 = arith.truncf %8 : vector<50x128xf32> to vector<50x128xbf16>
    %cst_8 = arith.constant dense<0.000000e+00> : vector<25x128xf32>
    %11 = tpu.matmul %9, %10, %cst_8 {dimension_numbers = #tpu.dot_dimension_numbers<[1], [0], [0], [1], [0, 0, 1, 1], [], []>} : vector<25x50xbf16>, vector<50x128xbf16>, vector<25x128xf32> -> vector<25x128xf32>
    %c0_9 = arith.constant 0 : index
    %c0_10 = arith.constant 0 : index
    %12 = vector.load %arg5[%c0_9, %c0_10] : memref<25x1xf32, #tpu.memory_space<vmem>>, vector<25x1xf32>
    %13 = vector.broadcast %12 : vector<25x1xf32> to vector<25x128xf32>
    %14 = arith.addf %11, %13 : vector<25x128xf32>
    %cst_11 = arith.constant 0.000000e+00 : f32
    %15 = vector.broadcast %cst_11 : f32 to vector<25x128xf32>
    %16 = arith.maximumf %14, %15 : vector<25x128xf32>
    %c0_12 = arith.constant 0 : index
    %c0_13 = arith.constant 0 : index
    %17 = vector.load %arg6[%c0_12, %c0_13] : memref<1x25xbf16, #tpu.memory_space<vmem>>, vector<1x25xbf16>
    %18 = arith.truncf %16 : vector<25x128xf32> to vector<25x128xbf16>
    %cst_14 = arith.constant dense<0.000000e+00> : vector<1x128xf32>
    %19 = tpu.matmul %17, %18, %cst_14 {dimension_numbers = #tpu.dot_dimension_numbers<[1], [0], [0], [1], [0, 0, 1, 1], [], []>} : vector<1x25xbf16>, vector<25x128xbf16>, vector<1x128xf32> -> vector<1x128xf32>
    %c0_15 = arith.constant 0 : index
    %c0_16 = arith.constant 0 : index
    %20 = vector.load %arg7[%c0_15, %c0_16] : memref<1x1xf32, #tpu.memory_space<vmem>>, vector<1x1xf32>
    %21 = vector.broadcast %20 : vector<1x1xf32> to vector<1x128xf32>
    %22 = arith.addf %19, %21 : vector<1x128xf32>
    %c0_17 = arith.constant 0 : index
    %c0_18 = arith.constant 0 : index
    %23 = vector.load %arg8[%c0_17, %c0_18] : memref<1x128xf32, #tpu.memory_space<vmem>>, vector<1x128xf32>
    tpu.vector_store %arg8[%c0_17, %c0_18], %22 {strides = array<i32>} : memref<1x128xf32, #tpu.memory_space<vmem>>, vector<1x128xf32>,
    return
  }
  func.func @transform_0(%arg0: i32) -> (i32, i32) {
    %c0_i32 = arith.constant 0 : i32
    %c0_i32_0 = arith.constant 0 : i32
    return %arg0, %c0_i32 : i32, i32
  }
  func.func @transform_1(%arg0: i32) -> (i32, i32) {
    %c0_i32 = arith.constant 0 : i32
    %c0_i32_0 = arith.constant 0 : i32
    %c0_i32_1 = arith.constant 0 : i32
    return %c0_i32, %c0_i32_0 : i32, i32
  }
  func.func @transform_2(%arg0: i32) -> (i32, i32) {
    %c0_i32 = arith.constant 0 : i32
    %c0_i32_0 = arith.constant 0 : i32
    %c0_i32_1 = arith.constant 0 : i32
    return %c0_i32, %c0_i32_0 : i32, i32
  }
  func.func @transform_3(%arg0: i32) -> (i32, i32) {
    %c0_i32 = arith.constant 0 : i32
    %c0_i32_0 = arith.constant 0 : i32
    %c0_i32_1 = arith.constant 0 : i32
    return %c0_i32, %c0_i32_0 : i32, i32
  }
  func.func @transform_4(%arg0: i32) -> (i32, i32) {
    %c0_i32 = arith.constant 0 : i32
    %c0_i32_0 = arith.constant 0 : i32
    %c0_i32_1 = arith.constant 0 : i32
    return %c0_i32, %c0_i32_0 : i32, i32
  }
  func.func @transform_5(%arg0: i32) -> (i32, i32) {
    %c0_i32 = arith.constant 0 : i32
    %c0_i32_0 = arith.constant 0 : i32
    %c0_i32_1 = arith.constant 0 : i32
    return %c0_i32, %c0_i32_0 : i32, i32
  }
  func.func @transform_6(%arg0: i32) -> (i32, i32) {
    %c0_i32 = arith.constant 0 : i32
    %c0_i32_0 = arith.constant 0 : i32
    %c0_i32_1 = arith.constant 0 : i32
    return %c0_i32, %c0_i32_0 : i32, i32
  }
  func.func @transform_7(%arg0: i32) -> (i32, i32) {
    %c0_i32 = arith.constant 0 : i32
    %c0_i32_0 = arith.constant 0 : i32
    return %c0_i32, %arg0 : i32, i32
  }
}

</mosaic_0001>

<bundles_post_ra>
// kernel: tpu_custom_call.1
= control target key start
LH: loop header
LB: loop body
LE: loop exit
PB: predicated region body
PF: predicated region fallthrough
CT: control target
= control target key end

     0   :  { %s722_s0 = inlined_call_operand.vmem [shape: f32[8,32], index: 0, kind: input, shape index: {}]   ;;  %s723_s1 = inlined_call_operand.vmem [shape: bf16[50,32], index: 1, kind: input, shape index: {}]   ;;  %s724_s2 = inlined_call_operand.vmem [shape: f32[50,1], index: 2, kind: input, shape index: {}]   ;;  %s725_s3 = inlined_call_operand.vmem [shape: bf16[25,50], index: 3, kind: input, shape index: {}]   ;;  %s726_s4 = inlined_call_operand.vmem [shape: f32[25,1], index: 4, kind: input, shape index: {}]   ;;  %s727_s5 = inlined_call_operand.vmem [shape: bf16[1,25], index: 5, kind: input, shape index: {}]   ;;  %s728_s6 = inlined_call_operand.<no memory space> [shape: f32[1,1], index: 6, kind: input, shape index: {}]   ;;  %s729_s7 = inlined_call_operand.hbm [shape: f32[1,8], index: 7, kind: output, shape index: {}]  }
   0x1   :  { %v12_v0 = vstv %s728_s6 }
   0x2   :  { %13 = vst [vmem:[#allocation2] sm:$0x1] %v12_v0 }
   0x3   :  { %v30_v1 = vld [vmem:[%s722_s0] sm:$0xff]  ;;  %v31_v2 = vld [vmem:[%s722_s0 + $0x8] sm:$0xff]  ;;  %vm121_vm0 = vcmask 261120   ;;  %v32_v3 = vld [vmem:[%s722_s0 + $0x10] sm:$0xff]  ;;  %v538_v6 = vmov 0  }
   0x4   :  { %v46_v4 = vpack.c.bf16 %v31_v2, %v30_v1  ;;  %v33_v5 = vld [vmem:[%s722_s0 + $0x18] sm:$0xff]  ;;  %506 = vset.pattern.permute.xlu0 %v538_v6  ;;  %507 = vset.pattern.permute.xlu1 %v538_v6  ;;  %v34_v9 = vld [vmem:[%s722_s0 + $0x20] sm:$0xff]  ;;  %v35_v10 = vld [vmem:[%s722_s0 + $0x28] sm:$0xff] }
   0x5   :  { %v47_v7 = vpack.c.bf16 %v33_v5, %v32_v3  ;;  %v508_v11 = vld [vmem:[%s723_s1] sm:$0xff]   ;;  %v48_v14 = vpack.c.bf16 %v35_v10, %v34_v9  ;;  %v63_v15 = vld [vmem:[%s724_s2 + $0x10] sm:$0xff]  ;;  %v62_v16 = vld [vmem:[%s724_s2 + $0x8] sm:$0xff] }
   0x6   :  { %492 = vmatprep.subr.msk.bf16.mxu0 %vm121_vm0, %v46_v4  ;;  %v135_v8 = vsel %vm121_vm0, %v46_v4, 0  ;;  %464 = vmatprep.mubr.msk.bf16.mxu0 %vm121_vm0, %v508_v11  ;;  %v61_v12 = vld [vmem:[%s724_s2] sm:$0xff]  ;;  %v64_v17 = vld [vmem:[%s724_s2 + $0x18] sm:$0xff]  ;;  %v36_v18 = vld [vmem:[%s722_s0 + $0x30] sm:$0xff] }
   0x7   :  { %449 = vmatpush3.bf16.xpose.msra.mxu0 %v135_v8  ;;  %v138_v13 = vsel %vm121_vm0, %v47_v7, 0  ;;  %70 = vperm.xlu0 %506, %v61_v12   ;;  %v37_v19 = vld [vmem:[%s722_s0 + $0x38] sm:$0xff]  ;;  %v65_v20 = vld [vmem:[%s724_s2 + $0x20] sm:$0xff] }
   0x8   :  { %493 = vmatprep.subr.msk.bf16.mxu0 %vm121_vm0, %v47_v7  ;;  %80 = vperm.xlu1 %507, %v63_v15  }
   0xb   :  { %75 = vperm.xlu0 %506, %v62_v16  }
   0xc   :  { %85 = vperm.xlu1 %507, %v64_v17  }
   0xf   :  { %451 = vmatpush3.bf16.xpose.msra.mxu0 %v138_v13 }
  0x10   :  { %494 = vmatprep.subr.msk.bf16.mxu0 %vm121_vm0, %v48_v14 }
  0x11   :  { %14 = vsyncpa [#allocation4], 0  ;;  %v66_v21 = vld [vmem:[%s724_s2 + $0x28] sm:$0xff]  ;;  %v141_v22 = vsel %vm121_vm0, %v48_v14, 0  ;;  %v49_v23 = vpack.c.bf16 %v37_v19, %v36_v18  ;;  %90 = vperm.xlu0 %506, %v65_v20   ;;  %v67_v24 = vld [vmem:[%s724_s2 + $0x30] sm:$0x3] }
  0x12   :  { %95 = vperm.xlu1 %507, %v66_v21   ;;  %v237_v25 = vld [vmem:[%s726_s4] sm:$0xff]  ;;  %v39_v27 = vld [vmem:[%s722_s0 + $0x48] sm:$0xff]  ;;  %v239_v29 = vld [vmem:[%s726_s4 + $0x10] sm:$0xff]  ;;  %vm271_vm1 = vcmask 408576   ;;  %vm278_vm2 = vcmask 1040384   ;;  %vm540_vm3 = vmmov 0  }
  0x13   :  { %v38_v26 = vld [vmem:[%s722_s0 + $0x40] sm:$0xff]  ;;  %v238_v28 = vld [vmem:[%s726_s4 + $0x8] sm:$0xff]  ;;  %v144_v30 = vsel %vm121_vm0, %v49_v23, 0  ;;  %v240_v32 = vld [vmem:[%s726_s4 + $0x18] sm:$0x1]  ;;  %vm352_vm4 = vcmask 1043456  }
  0x14   :  { %v50_v31 = vpack.c.bf16 %v39_v27, %v38_v26  ;;  %v338_v33 = vld [vmem:[#allocation2] sm:$0x1]  ;;  %v40_v34 = vld [vmem:[%s722_s0 + $0x50] sm:$0xff]  ;;  %v41_v35 = vld [vmem:[%s722_s0 + $0x58] sm:$0xff]  ;;  %vm353_vm5 = vcmask 1044480   ;;  %vm348_vm6 = vcmask 203776  }
  0x15   :  { %100 = vperm.xlu0 %506, %v67_v24   ;;  %v51_v37 = vpack.c.bf16 %v41_v35, %v40_v34  ;;  %v42_v38 = vld [vmem:[%s722_s0 + $0x60] sm:$0xff]  ;;  %v43_v39 = vld [vmem:[%s722_s0 + $0x68] sm:$0xff]  ;;  %v44_v42 = vld [vmem:[%s722_s0 + $0x70] sm:$0xff]  ;;  %s542_s17 = smov [#allocation3]  }
  0x16   :  { %243 = vperm.xlu1 %507, %v237_v25   ;;  %v147_v36 = vsel %vm121_vm0, %v50_v31, 0  ;;  %v52_v41 = vpack.c.bf16 %v43_v39, %v42_v38  ;;  %v45_v43 = vld [vmem:[%s722_s0 + $0x78] sm:$0xff]  ;;  %v509_v47 = vld [vmem:[%s723_s1 + $0x8] sm:$0xff]   ;;  %v510_v48 = vld [vmem:[%s723_s1 + $0x10] sm:$0xff]   ;;  %v541_v38 = vmov 65535   ;;  %s406_s2 = sshll.u32 %s542_s17, 4  ;;  %s407_s2 = int_to_ptr.vmem [resolvable:$true] %s406_s2 }
  0x17   :  { %453 = vmatpush3.bf16.xpose.msra.mxu0 %v141_v22  ;;  %v150_v40 = vsel %vm121_vm0, %v51_v37, 0  ;;  %v53_v45 = vpack.c.bf16 %v45_v43, %v44_v42  ;;  %v511_v49 = vld [vmem:[%s723_s1 + $0x18] ss:$0 sps:$4 sm:$0x11]   ;;  %v512_v50 = vld [vmem:[%s725_s3] sm:$0xff]   ;;  %v539_v22 = vmov 0.0   ;;  %p519_p1 = scmp.lt.s32.totalorder %s407_s2, %s407_s2 }
  0x18   :  { %495 = vmatprep.subr.msk.bf16.mxu0 %vm121_vm0, %v49_v23  ;;  %v153_v44 = vsel %vm121_vm0, %v52_v41, 0  ;;  %480 = vmatprep.mubr.msk.bf16.mxu1 %vm271_vm1, %v512_v50  ;;  %v513_v21 = vld [vmem:[%s725_s3 + $0x8] sm:$0x1f]   ;;  %v354_v39 = vsel %vm352_vm4, 4294967295, %v541_v38  ;;  %s514_s18 = scalar_lea.vmem %s407_s2, 16  ;;  %s518_s19 = scalar_lea.vmem %s407_s2, 32 }
  0x19   :  { %248 = vperm.xlu0 %506, %v238_v28   ;;  %v156_v46 = vsel %vm121_vm0, %v53_v45, 0  ;;  %v355_v43 = vsel %vm353_vm5, %v354_v39, 0  ;;  %p515_p0 = scmp.ne.s32.totalorder %s407_s2, %s514_s18  ;;  %p520_p2 = scmp.lt.s32.totalorder %s518_s19, %s514_s18 }
  0x1a   :  { %253 = vperm.xlu1 %507, %v239_v29  }
  0x1b   :  { %p521_p3 = por %p520_p2, %p519_p1 }
  0x1d   :  { %258 = vperm.xlu0 %506, %v240_v32   ;;  %p522_p4 = pnand %p521_p3, %p515_p0 }
  0x1e   :  { %341 = vperm.xlu1 %507, %v338_v33  }
  0x1f   :  { %455 = vmatpush3.bf16.xpose.msra.mxu0 %v144_v30 }
  0x20   :  { %496 = vmatprep.subr.msk.bf16.mxu0 %vm121_vm0, %v50_v31 }
  0x27   :  { %457 = vmatpush3.bf16.xpose.msra.mxu0 %v147_v36 }
  0x28   :  { %497 = vmatprep.subr.msk.bf16.mxu0 %vm121_vm0, %v51_v37 }
  0x2f   :  { %459 = vmatpush3.bf16.xpose.msra.mxu0 %v150_v40 }
  0x30   :  { %498 = vmatprep.subr.msk.bf16.mxu0 %vm121_vm0, %v52_v41 }
  0x37   :  { %461 = vmatpush3.bf16.xpose.msra.mxu0 %v153_v44 }
  0x38   :  { %499 = vmatprep.subr.msk.bf16.mxu0 %vm121_vm0, %v53_v45  ;;  %v335_v45 = vld [vmem:[%s727_s5] sm:$0x1] }
  0x3f   :  { %463 = vmatpush3.bf16.xpose.msra.mxu0 %v156_v46  ;;  %v344_v46 = vlaneseq }
  0x46   :  { %465 = vmatmul.mubr.msk.bf16.vlgmr.msra.gmra.mrb[0].mxu0 %vm121_vm0, %v509_v47  ;;  %v345_v47 = vshrl.u32 %v344_v46, 7 }
  0x47   :  { %468 = vmatprep.mubr.msk.bf16.mxu0 %vm121_vm0, %v510_v48 }
  0x48   :  { %v346_v48 = vsub.s32 0, %v345_v47 }
  0x4e   :  { %469 = vmatmul.mubr.msk.bf16.gmra.mrb[4].mxu0 %vm121_vm0, %v511_v49 }
  0x86   :  { %v71_v51 = vpop.permute.xlu0 %70 }
  0x87   :  { %v81_v52 = vpop.permute.xlu1 %80 }
  0x8a   :  { %v76_v53 = vpop.permute.xlu0 %75 }
  0x8b   :  { %v86_v57 = vpop.permute.xlu1 %85 }
  0x90   :  { %v91_v60 = vpop.permute.xlu0 %90 }
  0x91   :  { %v96_v12 = vpop.permute.xlu1 %95 }
  0x94   :  { %v101_v7 = vpop.permute.xlu0 %100 }
  0x95   :  { %v244_v23 = vpop.permute.xlu1 %243 }
  0x98   :  { %v249_v24 = vpop.permute.xlu0 %248 }
  0x99   :  { %v254_v25 = vpop.permute.xlu1 %253 }
  0x9c   :  { %v259_v29 = vpop.permute.xlu0 %258 }
  0x9d   :  { %v342_v49 = vpop.permute.xlu1 %341 }
  0x9e   :  { %v347_v50 = vrot.slane %v342_v49, %v346_v48 }
 0x119   :  { %v466_v54 = vpop.f32.mrb[0].mxu0 }
 0x11a   :  { %v201_v55 = vadd.f32 %v466_v54, %v81_v52  ;;  %v192_v56 = vpop.f32.mrb[1].mxu0 }
 0x11b   :  { %v193_v58 = vadd.f32 %v192_v56, %v71_v51  ;;  %v467_v59 = vpop.f32.mrb[2].mxu0 }
 0x11c   :  { %v204_v61 = vadd.f32 %v467_v59, %v86_v57  ;;  %v195_v62 = vpop.f32.mrb[3].mxu0  ;;  %v224_v0 = vmax.f32 %v201_v55, 0.0 }
 0x11d   :  { %v196_v63 = vadd.f32 %v195_v62, %v76_v53  ;;  %v222_v2 = vmax.f32 %v193_v58, 0.0 }
 0x11e   :  { %v225_v1 = vmax.f32 %v204_v61, 0.0 }
 0x11f   :  { %v223_v3 = vmax.f32 %v196_v63, 0.0 }
 0x120   :  { %v234_v4 = vpack.c.bf16 %v225_v1, %v224_v0 }
 0x121   :  { %v470_v5 = vpop.f32.mrb[4].mxu0  ;;  %v233_v6 = vpack.c.bf16 %v223_v3, %v222_v2 }
 0x122   :  { %v208_v8 = vpop.f32.mrb[5].mxu0  ;;  %v217_v9 = vadd.f32 %v470_v5, %v101_v7 }
 0x123   :  { %v209_v10 = vadd.f32 %v208_v8, %v91_v60  ;;  %v471_v11 = vpop.f32.mrb[6].mxu0  ;;  %472 = vmatprep.subr.bf16.mxu1 %v233_v6 }
 0x124   :  { %v211_v13 = vpop.f32.mrb[7].mxu0  ;;  %473 = vmatpush3.bf16.msra.mxu1 %v233_v6  ;;  %v228_v15 = vmax.f32 %v217_v9, 0.0 }
 0x125   :  { %v212_v14 = vadd.f32 %v211_v13, %v96_v12  ;;  %474 = vmatprep.subr.bf16.mxu1 %v234_v4  ;;  %v226_v16 = vmax.f32 %v209_v10, 0.0 }
 0x126   :  { %v236_v19 = vpack.c.bf16 %v228_v15, %v228_v15 }
 0x127   :  { %v227_v17 = vmax.f32 %v212_v14, 0.0 }
 0x128   :  { %475 = vmatpush3.bf16.msra.mxu1 %v234_v4  ;;  %v280_v20 = vsel %vm278_vm2, %v236_v19, 0 }
 0x129   :  { %v235_v18 = vpack.c.bf16 %v227_v17, %v226_v16 }
 0x12b   :  { %476 = vmatprep.subr.bf16.mxu1 %v235_v18 }
 0x12c   :  { %477 = vmatpush3.bf16.msra.mxu1 %v235_v18 }
 0x12d   :  { %500 = vmatprep.subr.msk.bf16.mxu1 %vm278_vm2, %v236_v19 }
 0x130   :  { %479 = vmatpush3.bf16.msra.mxu1 %v280_v20 }
 0x131   :  { %484 = vmatprep.subr.bf16.mxu1 %v539_v22 }
 0x133   :  { %481 = vmatmul.mubr.msk.bf16.vlgmr.msra.gmra.mrb[0].mxu1 %vm271_vm1, %v513_v21 }
 0x134   :  { %488 = vmatprep.mubr.msk.bf16.mxu1 %vm540_vm3, %v539_v22 }
 0x206   :  { %v482_v26 = vpop.f32.mrb[0].mxu1 }
 0x207   :  { %v325_v27 = vadd.f32 %v482_v26, %v254_v25  ;;  %v316_v28 = vpop.f32.mrb[1].mxu1 }
 0x208   :  { %v317_v30 = vadd.f32 %v316_v28, %v244_v23  ;;  %v483_v31 = vpop.f32.mrb[2].mxu1 }
 0x209   :  { %v328_v32 = vadd.f32 %v483_v31, %v259_v29  ;;  %v319_v33 = vpop.f32.mrb[3].mxu1  ;;  %v333_v35 = vmax.f32 %v325_v27, 0.0 }
 0x20a   :  { %v320_v34 = vadd.f32 %v319_v33, %v249_v24  ;;  %v331_v37 = vmax.f32 %v317_v30, 0.0 }
 0x20b   :  { %v334_v36 = vmax.f32 %v328_v32, 0.0 }
 0x20c   :  { %v332_v40 = vmax.f32 %v320_v34, 0.0 }
 0x20d   :  { %v337_v41 = vpack.c.bf16 %v334_v36, %v333_v35 }
 0x20e   :  { %v336_v42 = vpack.c.bf16 %v332_v40, %v331_v37 }
 0x20f   :  { %v357_v44 = vand.u32 %v355_v43, %v337_v41 }
 0x210   :  { %485 = vmatpush3.bf16.msra.mxu1 %v336_v42 }
 0x211   :  { %486 = vmatprep.subr.bf16.mxu1 %v539_v22 }
 0x214   :  { %487 = vmatpush3.bf16.msra.mxu1 %v357_v44 }
 0x217   :  { %489 = vmatmul.mubr.msk.bf16.vlgmr.msra.gmra.mrb[4].mxu1 %vm348_vm6, %v335_v45 }
 0x2ea   :  { %v393_v51 = vpop.f32.mrb[4].mxu1 }
 0x2eb   :  { %v394_v52 = vadd.f32 %v393_v51, %v347_v50  ;;  %v490_v53 = vpop.f32.mrb[5].mxu1 }
 0x2ec   :  { %v396_v54 = vpop.f32.mrb[6].mxu1 }
 0x2ed   :  { %399 = vst [vmem:[#allocation3] sm:$0x1] %v394_v52  ;;  %v491_v55 = vpop.f32.mrb[7].mxu1 }
 0x2ee   :  { %525 = shalt.err (!%p522_p4)
}
 0x2ef   :  { %s526_s21 = scalar_lea.hbm %s729_s7, 16 }
 0x2f0   :  { %p527_p5 = scmp.ne.s32.totalorder %s729_s7, %s526_s21  ;;  %p530_p6 = scmp.lt.u32.totalorder %s526_s21, %s729_s7 }
 0x2f2   :  { %p532_p7 = pnand %p530_p6, %p527_p5 }
 0x2f4   :  { %535 = shalt.err (!%p532_p7)
}
 0x2f5   :  { %409 = dma.vmem_to_hbm [thread:$0]  %s407_s2, 16, %s729_s7, [#allocation4]  }
 0x2f6   :  { %536 = dma.done.wait [#allocation4], 16  }
 0x2f7   :  { %537 = vsyncadd [#allocation4], 4294967280 }
 0x2f8   :  { %413 = vsyncpa [#allocation4], 1 }

</bundles_post_ra>
